<compile_context>
chip_gen: v7x
topology: tpu7x:2x2x1
jax: 0.10.0
libtpu: 0.0.40
codegen_flags: <defaults>
</compile_context>

<pallas_src>
import math
from typing import NamedTuple

import jax
import jax.numpy as jnp
from jax.experimental import pallas as pl
from jax.experimental.pallas import tpu as pltpu


# ---------------------------------------------------------------------------
# Kernels
# ---------------------------------------------------------------------------

def _folded_packed_kernel(x_ref, w_ref, b_ref, out_ref):
    # x_ref : (tm, pack*S)  lane-dense packed rows (pack samples per row)
    # w_ref : (pack*S, pack) block-diagonal folded weight, f32, VMEM-resident
    # b_ref : (1, 1) scalar folded bias in SMEM
    x = x_ref[...].astype(jnp.float32)
    v = jnp.dot(x, w_ref[...], preferred_element_type=jnp.float32)   # (tm, pack)
    out_ref[...] = (v + b_ref[0, 0]).astype(out_ref.dtype)


def _folded_row_kernel(x_ref, w_ref, b_ref, out_ref):
    # Fallback when S does not divide 128: x_ref (tm, S), w_ref (1, S) broadcast
    # row; VPU multiply + lane (XLU) reduce, exact f32.
    x = x_ref[...].astype(jnp.float32)
    v = jnp.sum(x * w_ref[...], axis=-1, keepdims=True)              # (tm, 1)
    out_ref[...] = (v + b_ref[0, 0]).astype(out_ref.dtype)


# ---------------------------------------------------------------------------
# Folding (hoisted: run once per weight update, NOT per forward call)
# ---------------------------------------------------------------------------

class FoldedValueNet(NamedTuple):
    w_row: jax.Array     # (1, S) f32   folded weight as a broadcast row
    w_packed: jax.Array  # (pack*S, pack) f32 block-diagonal (== (S,1) when pack == 1)
    b_eff: jax.Array     # (1, 1) f32   folded bias
    pack: int            # static: samples packed per 128-lane row
    state_dim: int       # static


def fold_value_net_params(w1, b1, w2, b2, w3, b3):
    """Fold fc3(fc2(fc1(x))) into one (S -> 1) affine map.

    Layout convention (matching init_linear_params below):
      w1: (S, H)   w2: (H, H)   w3: (1, H)  (PyTorch (out, in) row)
      b1: (1, H)   b2: (1, H)   b3: (1, 1)
    """
    hp = jax.lax.Precision.HIGHEST
    f32 = jnp.float32
    w1f, w2f, w3f = w1.astype(f32), w2.astype(f32), w3.astype(f32)
    b1f = jnp.asarray(b1, f32).reshape(1, -1)
    b2f = jnp.asarray(b2, f32).reshape(1, -1)
    b3f = jnp.asarray(b3, f32).reshape(1, 1)

    w_eff = jnp.dot(jnp.dot(w1f, w2f, precision=hp), w3f.T, precision=hp)      # (S, 1)
    b_eff = jnp.dot(jnp.dot(b1f, w2f, precision=hp) + b2f,
                    w3f.T, precision=hp) + b3f                                  # (1, 1)

    S = w_eff.shape[0]
    pack = (128 // S) if (S <= 128 and 128 % S == 0) else 1
    if pack > 1:
        # Column g holds w_eff in rows g*S : (g+1)*S  -> one dense matmul per tile.
        w_packed = jnp.kron(jnp.eye(pack, dtype=f32), w_eff)                    # (128, pack)
    else:
        w_packed = w_eff
    return FoldedValueNet(w_eff.T, w_packed, b_eff, pack, S)


# ---------------------------------------------------------------------------
# Tiling helpers
# ---------------------------------------------------------------------------

def _cdiv(a, b):
    return -(-a // b)


def _round_up(a, b):
    return _cdiv(a, b) * b


def _choose_tile_rows(n_rows, row_vmem_bytes, tile_bytes):
    """Rows per grid step: byte-budgeted, multiple of 8, and split >= 2 ways when
    possible so both v7x TensorCores get work on the 'parallel' grid axis."""
    tm = max(8, (int(tile_bytes) // int(row_vmem_bytes)) // 8 * 8)
    if tm >= n_rows:
        if n_rows >= 16:
            tm = _round_up(_cdiv(n_rows, 2), 8)   # 2-step grid, still multiple of 8
        else:
            tm = n_rows                           # single full-array block
    return tm


# ---------------------------------------------------------------------------
# Forward pass
# ---------------------------------------------------------------------------

def value_net_forward_folded(x, folded, *, tile_bytes=4 << 20, vmem_limit_bytes=None):
    """ValueNet forward using pre-folded params.  x: (B, S) -> (B, 1) float32.

    tile_bytes        : HBM payload of x per grid step (default 4 MiB; ~8.5 MiB of
                        VMEM double-buffered -> safe under all generations' scoped
                        defaults, including v5e's 16 MiB and v7x's 32 MiB).
    vmem_limit_bytes  : optional override if you raise tile_bytes.
    """
    B, S = x.shape
    assert S == folded.state_dim, "state_dim mismatch with folded params"
    pack = folded.pack
    itemsize = jnp.dtype(x.dtype).itemsize

    cparams = pltpu.CompilerParams(
        dimension_semantics=("parallel",),
        vmem_limit_bytes=vmem_limit_bytes,
    )
    smem_spec = pl.BlockSpec(memory_space=pltpu.MemorySpace.SMEM)

    if pack > 1:
        # ---- lane-dense packed path (S divides 128) ----
        L = pack * S                                   # == 128 lanes, fully dense
        Bp = _round_up(B, pack)
        xp = x if Bp == B else jnp.pad(x, ((0, Bp - B), (0, 0)))
        n_rows = Bp // pack
        xp = xp.reshape(n_rows, L)                     # contiguous -> free view

        tm = _choose_tile_rows(n_rows, L * itemsize, tile_bytes)
        grid = (pl.cdiv(n_rows, tm),)

        out = pl.pallas_call(
            _folded_packed_kernel,
            out_shape=jax.ShapeDtypeStruct((n_rows, pack), jnp.float32),
            grid=grid,
            in_specs=[
                pl.BlockSpec((tm, L), lambda i: (i, 0)),        # streamed x tiles
                pl.BlockSpec((L, pack), lambda i: (0, 0)),      # resident weight
                smem_spec,                                      # scalar bias
            ],
            out_specs=pl.BlockSpec((tm, pack), lambda i: (i, 0)),
            compiler_params=cparams,
        )(xp, folded.w_packed, folded.b_eff)

        out = out.reshape(Bp, 1)
        return out[:B] if Bp != B else out

    # ---- fallback path: S does not pack evenly into 128 lanes ----
    row_vmem_bytes = _round_up(S, 128) * itemsize      # lane-padded VMEM footprint
    tm = _choose_tile_rows(B, row_vmem_bytes, tile_bytes)
    grid = (pl.cdiv(B, tm),)

    return pl.pallas_call(
        _folded_row_kernel,
        out_shape=jax.ShapeDtypeStruct((B, 1), jnp.float32),
        grid=grid,
        in_specs=[
            pl.BlockSpec((tm, S), lambda i: (i, 0)),
            pl.BlockSpec((1, S), lambda i: (0, 0)),
            smem_spec,
        ],
        out_specs=pl.BlockSpec((tm, 1), lambda i: (i, 0)),
        compiler_params=cparams,
    )(x, folded.w_row, folded.b_eff)


def value_net_forward(x, w1, b1, w2, b2, w3, b3, **kwargs):
    """Drop-in convenience wrapper (folds per call).  For production RL loops,
    call fold_value_net_params once per weight update and reuse it."""
    return value_net_forward_folded(
        x, fold_value_net_params(w1, b1, w2, b2, w3, b3), **kwargs)


# ---------------------------------------------------------------------------
# Init + reference (layer-wise ground truth)
# ---------------------------------------------------------------------------

def init_linear_params(key, in_dim, out_dim):
    # torch.nn.Linear default init: U(-1/sqrt(in), 1/sqrt(in)) for W and b.
    kw, kb = jax.random.split(key)
    bound = 1.0 / math.sqrt(in_dim)
    w = jax.random.uniform(kw, (in_dim, out_dim), jnp.float32, -bound, bound)  # (in, out)
    b = jax.random.uniform(kb, (1, out_dim), jnp.float32, -bound, bound)       # (1, out)
    return w, b


def _reference(x, w1, b1, w2, b2, w3, b3):
    hp = jax.lax.Precision.HIGHEST
    h = jnp.dot(x, w1, precision=hp) + b1
    h = jnp.dot(h, w2, precision=hp) + b2
    return jnp.dot(h, w3.T, precision=hp) + b3


# ---------------------------------------------------------------------------
# Self-test
# ---------------------------------------------------------------------------

if __name__ == "__main__":
    state_dim = 16
    hidden_dim = 32
    batch = 8

    key = jax.random.PRNGKey(0)
    kx, k1, k2, k3, k4, k5 = jax.random.split(key, 6)

    x = jax.random.normal(kx, (batch, state_dim), jnp.float32)
    w1, b1 = init_linear_params(k1, state_dim, hidden_dim)
    w2, b2 = init_linear_params(k2, hidden_dim, hidden_dim)
    w3t, b3 = init_linear_params(k3, hidden_dim, 1)
    w3 = w3t.T  # (1, hidden): PyTorch (out, in) layout

    # Fold once (hoisted out of the per-step path).
    folded = fold_value_net_params(w1, b1, w2, b2, w3, b3)
    ref = _reference(x, w1, b1, w2, b2, w3, b3)

    # Small batch, packed (lane-dense) path.  The in-kernel contraction runs on the
    # MXU; allow for its f32 (multi-pass bf16) rounding.
    out = jax.block_until_ready(value_net_forward_folded(x, folded))
    assert out.shape == (batch, 1)
    assert jnp.allclose(out, ref, atol=5e-3, rtol=5e-3)

    # Medium batch: multi-step "parallel" grid over byte-budgeted packed tiles.
    big_B = 4096
    xb = jax.random.normal(jax.random.PRNGKey(1), (big_B, state_dim), jnp.float32)
    out_b = jax.block_until_ready(value_net_forward_folded(xb, folded))
    ref_b = _reference(xb, w1, b1, w2, b2, w3, b3)
    assert out_b.shape == (big_B, 1)
    assert jnp.allclose(out_b, ref_b, atol=5e-3, rtol=5e-3)

    # Odd batch: exercises padding to a multiple of the lane pack.
    odd_B = 37
    xo = jax.random.normal(jax.random.PRNGKey(2), (odd_B, state_dim), jnp.float32)
    out_o = jax.block_until_ready(value_net_forward_folded(xo, folded))
    ref_o = _reference(xo, w1, b1, w2, b2, w3, b3)
    assert out_o.shape == (odd_B, 1)
    assert jnp.allclose(out_o, ref_o, atol=5e-3, rtol=5e-3)

    # Fallback layout: state_dim that does not divide 128 (exact f32 VPU path).
    s2 = 24
    x2 = jax.random.normal(k4, (16, s2), jnp.float32)
    w1b, b1b = init_linear_params(k5, s2, hidden_dim)
    folded2 = fold_value_net_params(w1b, b1b, w2, b2, w3, b3)
    out2 = jax.block_until_ready(value_net_forward_folded(x2, folded2))
    ref2 = _reference(x2, w1b, b1b, w2, b2, w3, b3)
    assert out2.shape == (16, 1)
    assert jnp.allclose(out2, ref2, atol=1e-4, rtol=1e-4)

    # Drop-in convenience wrapper (folds internally).
    out_c = jax.block_until_ready(value_net_forward(x, w1, b1, w2, b2, w3, b3))
    assert jnp.allclose(out_c, ref, atol=5e-3, rtol=5e-3)

    print("KERNEL_OK")
</pallas_src>

<mosaic_0001>
module attributes {stable_mosaic.version = 11 : i64} {
  func.func @_folded_packed_kernel(%arg0: i32, %arg1: memref<1x128xf32, #tpu.memory_space<vmem>>, %arg2: memref<128x8xf32, #tpu.memory_space<vmem>>, %arg3: memref<1x1xf32, #tpu.memory_space<smem>>, %arg4: memref<1x8xf32, #tpu.memory_space<vmem>>) attributes {dimension_semantics = [#tpu.dimension_semantics<parallel>], iteration_bounds = array<i64: 1>, scalar_prefetch = 0 : i64, scratch_operands = 0 : i64, tpu.core_type = #tpu.core_type<tc>, window_params = [{transform_indices = @transform_0, window_bounds = array<i64: 1, 128>}, {pipeline_mode = #tpu.pipeline_mode<synchronous>, transform_indices = @transform_1, window_bounds = array<i64: 128, 8>}, {transform_indices = @transform_2, window_bounds = array<i64: 1, 1>}, {transform_indices = @transform_3, window_bounds = array<i64: 1, 8>}]} {
    %c0 = arith.constant 0 : index
    %c0_0 = arith.constant 0 : index
    %0 = vector.load %arg1[%c0, %c0_0] : memref<1x128xf32, #tpu.memory_space<vmem>>, vector<1x128xf32>
    %c0_1 = arith.constant 0 : index
    %c0_2 = arith.constant 0 : index
    %1 = vector.load %arg2[%c0_1, %c0_2] : memref<128x8xf32, #tpu.memory_space<vmem>>, vector<128x8xf32>
    %cst = arith.constant dense<0.000000e+00> : vector<1x8xf32>
    %2 = tpu.matmul %0, %1, %cst {dimension_numbers = #tpu.dot_dimension_numbers<[1], [0], [0], [1], [0, 0, 1, 1], [], []>} : vector<1x128xf32>, vector<128x8xf32>, vector<1x8xf32> -> vector<1x8xf32>
    %c0_3 = arith.constant 0 : index
    %c0_4 = arith.constant 0 : index
    %3 = memref.load %arg3[%c0_3, %c0_4] : memref<1x1xf32, #tpu.memory_space<smem>>
    %4 = vector.broadcast %3 : f32 to vector<1x8xf32>
    %5 = arith.addf %2, %4 : vector<1x8xf32>
    %c0_5 = arith.constant 0 : index
    %c0_6 = arith.constant 0 : index
    %6 = vector.load %arg4[%c0_5, %c0_6] : memref<1x8xf32, #tpu.memory_space<vmem>>, vector<1x8xf32>
    tpu.vector_store %arg4[%c0_5, %c0_6], %5 {strides = array<i32>} : memref<1x8xf32, #tpu.memory_space<vmem>>, vector<1x8xf32>,
    return
  }
  func.func @transform_0(%arg0: i32) -> (i32, i32) {
    %c0_i32 = arith.constant 0 : i32
    %c0_i32_0 = arith.constant 0 : i32
    return %arg0, %c0_i32 : i32, i32
  }
  func.func @transform_1(%arg0: i32) -> (i32, i32) {
    %c0_i32 = arith.constant 0 : i32
    %c0_i32_0 = arith.constant 0 : i32
    %c0_i32_1 = arith.constant 0 : i32
    return %c0_i32, %c0_i32_0 : i32, i32
  }
  func.func @transform_2(%arg0: i32) -> (i32, i32) {
    %c0_i32 = arith.constant 0 : i32
    %c0_i32_0 = arith.constant 0 : i32
    %c0_i32_1 = arith.constant 0 : i32
    return %c0_i32, %c0_i32_0 : i32, i32
  }
  func.func @transform_3(%arg0: i32) -> (i32, i32) {
    %c0_i32 = arith.constant 0 : i32
    %c0_i32_0 = arith.constant 0 : i32
    return %arg0, %c0_i32 : i32, i32
  }
}

</mosaic_0001>

<bundles_post_ra>
// kernel: tpu_custom_call.1
= control target key start
LH: loop header
LB: loop body
LE: loop exit
PB: predicated region body
PF: predicated region fallthrough
CT: control target
= control target key end

     0   :  { %v225_v3 = vmov 0.0|0.0   ;;  %vm226_vm0 = vmmov 0   ;;  %v227_v6 = vmov 0.0   ;;  %s315_s0 = inlined_call_operand.vmem [shape: f32[1,128], index: 0, kind: input, shape index: {}]   ;;  %s316_s1 = inlined_call_operand.vmem [shape: f32[128,8], index: 1, kind: input, shape index: {}]   ;;  %s317_s2 = inlined_call_operand.<no memory space> [shape: f32[1,1], index: 2, kind: input, shape index: {}]   ;;  %s318_s3 = inlined_call_operand.hbm [shape: f32[1,8], index: 3, kind: output, shape index: {}]  }
   0x1   :  { %v17_v0 = vld [vmem:[%s316_s1] sm:$0xff]  ;;  %v18_v1 = vld [vmem:[%s316_s1 + $0x8] sm:$0xff]  ;;  %v19_v2 = vld [vmem:[%s316_s1 + $0x10] sm:$0xff]  ;;  %173 = vmatprep.subr.bf16.mxu0 %v225_v3  ;;  %170 = vmatprep.mubr.msk.f32.mxu0 %vm226_vm0, %v227_v6 }
   0x2   :  { %v174_v4 = vpack.c.bf16 %v18_v1, %v17_v0  ;;  %v20_v5 = vld [vmem:[%s316_s1 + $0x18] sm:$0xff]  ;;  %v21_v8 = vld [vmem:[%s316_s1 + $0x20] sm:$0xff]  ;;  %v22_v9 = vld [vmem:[%s316_s1 + $0x28] sm:$0xff] }
   0x3   :  { %v177_v7 = vpack.c.bf16 %v20_v5, %v19_v2 }
   0x4   :  { %175 = vmatpush3.bf16.msra.mxu0 %v174_v4 }
   0x5   :  { %176 = vmatprep.subr.bf16.mxu0 %v225_v3 }
   0x6   :  { %9 = vsyncpa [#allocation4], 0  ;;  %v180_v10 = vpack.c.bf16 %v22_v9, %v21_v8  ;;  %v23_v11 = vld [vmem:[%s316_s1 + $0x30] sm:$0xff]  ;;  %v24_v12 = vld [vmem:[%s316_s1 + $0x38] sm:$0xff]  ;;  %v34_v27 = vstv %s317_s2  ;;  %s228_s21 = smov [#allocation3]   ;;  %vm105_vm1 = vcmask 57344  }
   0x7   :  { %v183_v13 = vpack.c.bf16 %v24_v12, %v23_v11  ;;  %v25_v14 = vld [vmem:[%s316_s1 + $0x40] sm:$0xff]  ;;  %v26_v15 = vld [vmem:[%s316_s1 + $0x48] sm:$0xff]  ;;  %v27_v17 = vld [vmem:[%s316_s1 + $0x50] sm:$0xff]  ;;  %s113_s22 = sshll.u32 %s228_s21, 4  ;;  %s114_s22 = int_to_ptr.vmem [resolvable:$true] %s113_s22 }
   0x8   :  { %178 = vmatpush3.bf16.msra.mxu0 %v177_v7  ;;  %v186_v16 = vpack.c.bf16 %v26_v15, %v25_v14  ;;  %v28_v18 = vld [vmem:[%s316_s1 + $0x58] sm:$0xff]  ;;  %v29_v20 = vld [vmem:[%s316_s1 + $0x60] sm:$0xff]  ;;  %v30_v21 = vld [vmem:[%s316_s1 + $0x68] sm:$0xff]  ;;  %s205_s23 = scalar_lea.vmem %s114_s22, 32  ;;  %p206_p1 = scmp.lt.s32.totalorder %s114_s22, %s114_s22 }
   0x9   :  { %179 = vmatprep.subr.bf16.mxu0 %v225_v3  ;;  %v189_v19 = vpack.c.bf16 %v28_v18, %v27_v17  ;;  %v192_v22 = vpack.c.bf16 %v30_v21, %v29_v20  ;;  %v31_v23 = vld [vmem:[%s316_s1 + $0x70] sm:$0xff]  ;;  %v32_v24 = vld [vmem:[%s316_s1 + $0x78] sm:$0xff]  ;;  %v16_v26 = vld [vmem:[%s315_s0] sm:$0x1]  ;;  %s201_s1 = scalar_lea.vmem %s114_s22, 16 }
   0xa   :  { %v195_v25 = vpack.c.bf16 %v32_v24, %v31_v23  ;;  %p202_p0 = scmp.ne.s32.totalorder %s114_s22, %s201_s1  ;;  %p207_p2 = scmp.lt.s32.totalorder %s205_s23, %s201_s1 }
   0xc   :  { %181 = vmatpush3.bf16.msra.mxu0 %v180_v10  ;;  %p208_p3 = por %p207_p2, %p206_p1 }
   0xd   :  { %182 = vmatprep.subr.bf16.mxu0 %v225_v3 }
   0xe   :  { %p209_p4 = pnand %p208_p3, %p202_p0 }
  0x10   :  { %184 = vmatpush3.bf16.msra.mxu0 %v183_v13 }
  0x11   :  { %185 = vmatprep.subr.bf16.mxu0 %v225_v3 }
  0x14   :  { %187 = vmatpush3.bf16.msra.mxu0 %v186_v16 }
  0x15   :  { %188 = vmatprep.subr.bf16.mxu0 %v225_v3 }
  0x18   :  { %190 = vmatpush3.bf16.msra.mxu0 %v189_v19 }
  0x19   :  { %191 = vmatprep.subr.bf16.mxu0 %v225_v3 }
  0x1c   :  { %193 = vmatpush3.bf16.msra.mxu0 %v192_v22 }
  0x1d   :  { %194 = vmatprep.subr.bf16.mxu0 %v225_v3 }
  0x20   :  { %196 = vmatpush3.bf16.msra.mxu0 %v195_v25 }
  0x23   :  { %171 = vmatmul.mubr.f32.vlgmr.msra.gmra.mrb[0].mxu0 %v16_v26 }
  0xf6   :  { %v101_v28 = vpop.f32.mrb[0].mxu0 }
  0xf7   :  { %v102_v29 = vadd.f32 %v101_v28, %v34_v27  ;;  %v172_v30 = vpop.f32.mrb[1].mxu0 }
  0xf9   :  { %106 = vst.msk [vmem:[#allocation3] sm:$0x1] %vm105_vm1, %v102_v29 }
  0xfa   :  { %212 = shalt.err (!%p209_p4)
}
  0xfb   :  { %s213_s2 = scalar_lea.hbm %s318_s3, 16 }
  0xfc   :  { %p214_p5 = scmp.ne.s32.totalorder %s318_s3, %s213_s2  ;;  %p217_p6 = scmp.lt.u32.totalorder %s213_s2, %s318_s3 }
  0xfe   :  { %p219_p7 = pnand %p217_p6, %p214_p5 }
 0x100   :  { %222 = shalt.err (!%p219_p7)
}
 0x101   :  { %116 = dma.vmem_to_hbm [thread:$0]  %s114_s22, 16, %s318_s3, [#allocation4]  }
 0x102   :  { %223 = dma.done.wait [#allocation4], 16  }
 0x103   :  { %224 = vsyncadd [#allocation4], 4294967280 }
 0x104   :  { %120 = vsyncpa [#allocation4], 1 }

</bundles_post_ra>
